<compile_context>
chip_gen: v5e
topology: v5e:2x2
jax: 0.10.0
libtpu: 0.0.40
codegen_flags: <defaults>
</compile_context>

<pallas_src>
import jax
import jax.numpy as jnp
from jax import lax
from jax.experimental import pallas as pl
from jax.experimental.pallas import tpu as pltpu


def _round_up(x, m):
    return (x + m - 1) // m * m


# ------------------------------- fused kernel -------------------------------

def _make_spp_kernel(Wp):
    def _pool5(y, L):
        # y: (C, L) flat padded spatial with -inf at every guard/tail position.
        # Separable 5x5 stride-1 "same" max pool via circular lane rolls; the 2-wide
        # guard band guarantees wrapped reads from real positions only ever see -inf.
        t = y
        for d in (1, 2):                          # W direction: +-1, +-2 columns
            t = jnp.maximum(t, pltpu.roll(y, shift=d, axis=1))
            t = jnp.maximum(t, pltpu.roll(y, shift=L - d, axis=1))
        out = t
        for d in (Wp, 2 * Wp):                    # H direction: +-1, +-2 rows
            out = jnp.maximum(out, pltpu.roll(t, shift=d, axis=1))
            out = jnp.maximum(out, pltpu.roll(t, shift=L - d, axis=1))
        return out

    def kernel(x_ref, nmask_ref, w1_ref, b1_ref, w2_ref, b2_ref, o_ref):
        L = x_ref.shape[2]
        x = x_ref[0]                               # (Cin, L) bf16
        nmask = nmask_ref[...]                     # (1, L) f32: 0 on valid pixels, -inf on guards/tail

        # conv1 (1x1, BN scale pre-folded into w1) + bias + SiLU.  bf16 MXU, f32 accumulate.
        y = jnp.dot(w1_ref[...], x, preferred_element_type=jnp.float32) + b1_ref[...]
        y = y * jax.nn.sigmoid(y)                  # (Chid, L) f32

        # conv2 over the virtual channel concat [y, pool5, pool9, pool13], interleaved
        # with the SPPF cascade so MXU work overlaps XLU/VPU pooling and only one extra
        # (Chid, L) intermediate is live at a time.  Guard/tail lanes may go inf/NaN in
        # acc; they are sliced off by the wrapper.
        acc = jnp.dot(w2_ref[0], y.astype(jnp.bfloat16),
                      preferred_element_type=jnp.float32)
        p = _pool5(y + nmask, L)                                   # 5x5
        acc = acc + jnp.dot(w2_ref[1], p.astype(jnp.bfloat16),
                            preferred_element_type=jnp.float32)
        p = _pool5(p + nmask, L)                                   # 9x9 (5 o 5)
        acc = acc + jnp.dot(w2_ref[2], p.astype(jnp.bfloat16),
                            preferred_element_type=jnp.float32)
        p = _pool5(p + nmask, L)                                   # 13x13 (5 o 5 o 5)
        acc = acc + jnp.dot(w2_ref[3], p.astype(jnp.bfloat16),
                            preferred_element_type=jnp.float32)

        acc = acc + b2_ref[...]
        o_ref[0] = (acc * jax.nn.sigmoid(acc)).astype(o_ref.dtype)   # SiLU

    return kernel


# --------------------------------- wrapper ----------------------------------

def spp_bottleneck(x_nchw, params, kernel_sizes=(5, 9, 13)):
    assert tuple(kernel_sizes) == (5, 9, 13), "cascaded pooling assumes default SPP sizes"
    N, Cin, H, W = x_nchw.shape
    Chid = params["w1"].shape[0]
    Cout = params["w2"].shape[1]

    Hp, Wp = H + 2, W + 2                      # 2-wide guard band (shared via circular wrap)
    L = _round_up(Hp * Wp, 128)                # lane-dense flat spatial axis

    # Single cheap zero-pad of the input; stays channel-major (no transposes).
    x_p = jnp.pad(x_nchw, ((0, 0), (0, 0), (0, Hp - H), (0, Wp - W)))
    x_flat = jnp.pad(x_p.reshape(N, Cin, Hp * Wp),
                     ((0, 0), (0, 0), (0, L - Hp * Wp))).astype(jnp.bfloat16)

    idx = jnp.arange(L, dtype=jnp.int32)
    valid = ((idx // Wp) < H) & ((idx % Wp) < W)
    neg_mask = jnp.where(valid, 0.0, -jnp.inf).astype(jnp.float32).reshape(1, L)

    # Fold eval-mode BN scales into the 1x1 conv weights; pass only biases.  bf16 operands.
    w1 = (params["w1"] * params["s1"]).astype(jnp.bfloat16)          # (Chid, Cin)
    b1 = params["b1"].astype(jnp.float32)                            # (Chid, 1)
    w2 = (params["w2"] * params["s2"][None]).astype(jnp.bfloat16)    # (4, Cout, Chid)
    b2 = params["b2"].astype(jnp.float32)                            # (Cout, 1)

    flops = 2 * N * L * Chid * (Cin + 4 * Cout) + 24 * N * Chid * L
    bytes_accessed = (2 * x_flat.size + 4 * N * Cout * L + 4 * neg_mask.size
                      + 2 * (w1.size + w2.size) + 4 * (b1.size + b2.size))
    cost = pl.CostEstimate(flops=int(flops),
                           transcendentals=int(N * L * (Chid + Cout)),
                           bytes_accessed=int(bytes_accessed))

    # VMEM budget from actual block traffic: double-buffered x/out/mask blocks,
    # (double-buffered) weights, and the live f32 intermediates (y, one pool, acc, temps).
    block_bytes = (2 * Cin * L * 2                     # x blocks (bf16, double buffered)
                   + 2 * Cout * L * 4                  # out blocks (f32, double buffered)
                   + 2 * L * 4                         # mask block
                   + 2 * (w1.size + w2.size) * 2       # bf16 weights
                   + 2 * (b1.size + b2.size) * 4       # f32 biases
                   + 4 * (4 * Chid * L + 2 * Cout * L))  # live f32 intermediates
    vmem_limit = int(min(48 * 1024 * 1024, max(8 * 1024 * 1024, 2 * block_bytes)))

    out_flat = pl.pallas_call(
        _make_spp_kernel(Wp),
        out_shape=jax.ShapeDtypeStruct((N, Cout, L), jnp.float32),
        grid=(N,),
        in_specs=[
            pl.BlockSpec((1, Cin, L), lambda n: (n, 0, 0)),      # x (per image)
            pl.BlockSpec((1, L), lambda n: (0, 0)),              # additive 0/-inf mask
            pl.BlockSpec((Chid, Cin), lambda n: (0, 0)),         # w1 (BN scale folded)
            pl.BlockSpec((Chid, 1), lambda n: (0, 0)),           # b1
            pl.BlockSpec((4, Cout, Chid), lambda n: (0, 0, 0)),  # w2 (per concat group)
            pl.BlockSpec((Cout, 1), lambda n: (0, 0)),           # b2
        ],
        out_specs=pl.BlockSpec((1, Cout, L), lambda n: (n, 0, 0)),
        compiler_params=pltpu.CompilerParams(
            dimension_semantics=("parallel",),
            vmem_limit_bytes=vmem_limit),
        cost_estimate=cost,
    )(x_flat, neg_mask, w1, b1, w2, b2)

    # Guard/tail lanes may contain inf/NaN by design; slice them off here.
    return out_flat[:, :, :Hp * Wp].reshape(N, Cout, Hp, Wp)[:, :, :H, :W]


# --------------------------- parameters / reference --------------------------

def init_params(key, in_channels, out_channels, kernel_sizes=(5, 9, 13)):
    """Synthetic weights.  conv weights are (Cout, Cin) (== torch weight[:,:,0,0]);
    conv2 weight is stored grouped as (4, Cout, Chid) matching the concat order
    [y1, pool5, pool9, pool13].  BatchNorm (eval mode) expressed as scale/bias."""
    hidden = in_channels // 2
    n_feats = len(kernel_sizes) + 1
    eps = 1e-5
    ks = jax.random.split(key, 10)

    def conv_bn(kw, kg, kb, km, kv, w_shape, cout):
        w = 0.1 * jax.random.normal(kw, w_shape, jnp.float32)
        gamma = 1.0 + 0.1 * jax.random.normal(kg, (cout,), jnp.float32)
        beta = 0.1 * jax.random.normal(kb, (cout,), jnp.float32)
        mean = 0.1 * jax.random.normal(km, (cout,), jnp.float32)
        var = jnp.abs(jax.random.normal(kv, (cout,), jnp.float32)) + 0.5
        scale = gamma / jnp.sqrt(var + eps)
        bias = beta - mean * scale
        return w, scale.reshape(cout, 1), bias.reshape(cout, 1)

    w1, s1, b1 = conv_bn(*ks[0:5], (hidden, in_channels), hidden)
    w2, s2, b2 = conv_bn(*ks[5:10], (n_feats, out_channels, hidden), out_channels)
    return dict(w1=w1, s1=s1, b1=b1, w2=w2, s2=s2, b2=b2)


def spp_reference(x_nchw, params, kernel_sizes=(5, 9, 13)):
    def conv_bn_silu(x, w_oc_ic, s, b):
        y = jnp.einsum("oc,nchw->nohw", w_oc_ic, x)
        y = y * s.reshape(1, -1, 1, 1) + b.reshape(1, -1, 1, 1)
        return y * jax.nn.sigmoid(y)

    def maxpool(x, ksz):
        p = ksz // 2
        return lax.reduce_window(x, -jnp.inf, lax.max,
                                 (1, 1, ksz, ksz), (1, 1, 1, 1),
                                 ((0, 0), (0, 0), (p, p), (p, p)))

    y = conv_bn_silu(x_nchw, params["w1"], params["s1"], params["b1"])
    cat = jnp.concatenate([y] + [maxpool(y, k) for k in kernel_sizes], axis=1)
    w2 = params["w2"]                                   # (4, Cout, Chid)
    G, Cout, Chid = w2.shape
    w2_full = jnp.transpose(w2, (1, 0, 2)).reshape(Cout, G * Chid)
    return conv_bn_silu(cat, w2_full, params["s2"], params["b2"])


# ----------------------------------- main -----------------------------------

if __name__ == "__main__":
    key = jax.random.PRNGKey(0)
    kx, kp = jax.random.split(key)

    N, Cin, H, W = 2, 16, 16, 16
    Cout = 16
    x = jax.random.normal(kx, (N, Cin, H, W), jnp.float32)
    params = init_params(kp, Cin, Cout)

    out = jax.block_until_ready(spp_bottleneck(x, params))
    assert out.shape == (N, Cout, H, W), out.shape
    assert bool(jnp.all(jnp.isfinite(out))), "non-finite values in valid output region"

    ref = spp_reference(x, params)
    err = float(jnp.max(jnp.abs(out - ref)))
    # bf16 MXU operands with f32 accumulation vs. the all-f32 reference.
    assert err < 5e-2, f"max abs err {err}"

    print("KERNEL_OK")
</pallas_src>

<mosaic_0001>
module attributes {stable_mosaic.version = 11 : i64} {
  func.func @kernel(%arg0: i32, %arg1: memref<1x16x384xbf16, #tpu.memory_space<vmem>>, %arg2: memref<1x384xf32, #tpu.memory_space<vmem>>, %arg3: memref<8x16xbf16, #tpu.memory_space<vmem>>, %arg4: memref<8x1xf32, #tpu.memory_space<vmem>>, %arg5: memref<4x16x8xbf16, #tpu.memory_space<vmem>>, %arg6: memref<16x1xf32, #tpu.memory_space<vmem>>, %arg7: memref<1x16x384xf32, #tpu.memory_space<vmem>>) attributes {dimension_semantics = [#tpu.dimension_semantics<parallel>], iteration_bounds = array<i64: 2>, scalar_prefetch = 0 : i64, scratch_operands = 0 : i64, tpu.core_type = #tpu.core_type<tc>, window_params = [{transform_indices = @transform_0, window_bounds = array<i64: 1, 16, 384>}, {pipeline_mode = #tpu.pipeline_mode<synchronous>, transform_indices = @transform_1, window_bounds = array<i64: 1, 384>}, {pipeline_mode = #tpu.pipeline_mode<synchronous>, transform_indices = @transform_2, window_bounds = array<i64: 8, 16>}, {pipeline_mode = #tpu.pipeline_mode<synchronous>, transform_indices = @transform_3, window_bounds = array<i64: 8, 1>}, {pipeline_mode = #tpu.pipeline_mode<synchronous>, transform_indices = @transform_4, window_bounds = array<i64: 4, 16, 8>}, {pipeline_mode = #tpu.pipeline_mode<synchronous>, transform_indices = @transform_5, window_bounds = array<i64: 16, 1>}, {transform_indices = @transform_6, window_bounds = array<i64: 1, 16, 384>}]} {
    %c0 = arith.constant 0 : index
    %c0_0 = arith.constant 0 : index
    %c0_1 = arith.constant 0 : index
    %0 = vector.load %arg1[%c0, %c0_0, %c0_1] : memref<1x16x384xbf16, #tpu.memory_space<vmem>>, vector<1x16x384xbf16>
    %1 = vector.shape_cast %0 : vector<1x16x384xbf16> to vector<16x384xbf16>
    %c0_2 = arith.constant 0 : index
    %c0_3 = arith.constant 0 : index
    %2 = vector.load %arg2[%c0_2, %c0_3] : memref<1x384xf32, #tpu.memory_space<vmem>>, vector<1x384xf32>
    %c0_4 = arith.constant 0 : index
    %c0_5 = arith.constant 0 : index
    %3 = vector.load %arg3[%c0_4, %c0_5] : memref<8x16xbf16, #tpu.memory_space<vmem>>, vector<8x16xbf16>
    %cst = arith.constant dense<0.000000e+00> : vector<8x384xf32>
    %4 = tpu.matmul %3, %1, %cst {dimension_numbers = #tpu.dot_dimension_numbers<[1], [0], [0], [1], [0, 0, 1, 1], [], []>} : vector<8x16xbf16>, vector<16x384xbf16>, vector<8x384xf32> -> vector<8x384xf32>
    %c0_6 = arith.constant 0 : index
    %c0_7 = arith.constant 0 : index
    %5 = vector.load %arg4[%c0_6, %c0_7] : memref<8x1xf32, #tpu.memory_space<vmem>>, vector<8x1xf32>
    %6 = vector.broadcast %5 : vector<8x1xf32> to vector<8x384xf32>
    %7 = arith.addf %4, %6 : vector<8x384xf32>
    %8 = arith.negf %7 : vector<8x384xf32>
    %9 = math.exp %8 : vector<8x384xf32>
    %cst_8 = arith.constant 1.000000e+00 : f32
    %10 = vector.broadcast %cst_8 : f32 to vector<8x384xf32>
    %11 = arith.addf %10, %9 : vector<8x384xf32>
    %12 = arith.divf %10, %11 : vector<8x384xf32>
    %13 = arith.mulf %7, %12 : vector<8x384xf32>
    %c0_9 = arith.constant 0 : index
    %c0_10 = arith.constant 0 : index
    %c0_11 = arith.constant 0 : index
    %14 = vector.load %arg5[%c0_9, %c0_10, %c0_11] : memref<4x16x8xbf16, #tpu.memory_space<vmem>>, vector<1x16x8xbf16>
    %15 = vector.shape_cast %14 : vector<1x16x8xbf16> to vector<16x8xbf16>
    %16 = arith.truncf %13 : vector<8x384xf32> to vector<8x384xbf16>
    %cst_12 = arith.constant dense<0.000000e+00> : vector<16x384xf32>
    %17 = tpu.matmul %15, %16, %cst_12 {dimension_numbers = #tpu.dot_dimension_numbers<[1], [0], [0], [1], [0, 0, 1, 1], [], []>} : vector<16x8xbf16>, vector<8x384xbf16>, vector<16x384xf32> -> vector<16x384xf32>
    %18 = vector.broadcast %2 : vector<1x384xf32> to vector<8x384xf32>
    %19 = arith.addf %13, %18 : vector<8x384xf32>
    %c1_i32 = arith.constant 1 : i32
    %20 = tpu.dynamic_rotate %19 by %c1_i32 dim 1 : vector<8x384xf32>, i32 -> vector<8x384xf32>
    %21 = arith.maximumf %19, %20 : vector<8x384xf32>
    %c383_i32 = arith.constant 383 : i32
    %22 = tpu.dynamic_rotate %19 by %c383_i32 dim 1 : vector<8x384xf32>, i32 -> vector<8x384xf32>
    %23 = arith.maximumf %21, %22 : vector<8x384xf32>
    %c2_i32 = arith.constant 2 : i32
    %24 = tpu.dynamic_rotate %19 by %c2_i32 dim 1 : vector<8x384xf32>, i32 -> vector<8x384xf32>
    %25 = arith.maximumf %23, %24 : vector<8x384xf32>
    %c382_i32 = arith.constant 382 : i32
    %26 = tpu.dynamic_rotate %19 by %c382_i32 dim 1 : vector<8x384xf32>, i32 -> vector<8x384xf32>
    %27 = arith.maximumf %25, %26 : vector<8x384xf32>
    %c18_i32 = arith.constant 18 : i32
    %28 = tpu.dynamic_rotate %27 by %c18_i32 dim 1 : vector<8x384xf32>, i32 -> vector<8x384xf32>
    %29 = arith.maximumf %27, %28 : vector<8x384xf32>
    %c366_i32 = arith.constant 366 : i32
    %30 = tpu.dynamic_rotate %27 by %c366_i32 dim 1 : vector<8x384xf32>, i32 -> vector<8x384xf32>
    %31 = arith.maximumf %29, %30 : vector<8x384xf32>
    %c36_i32 = arith.constant 36 : i32
    %32 = tpu.dynamic_rotate %27 by %c36_i32 dim 1 : vector<8x384xf32>, i32 -> vector<8x384xf32>
    %33 = arith.maximumf %31, %32 : vector<8x384xf32>
    %c348_i32 = arith.constant 348 : i32
    %34 = tpu.dynamic_rotate %27 by %c348_i32 dim 1 : vector<8x384xf32>, i32 -> vector<8x384xf32>
    %35 = arith.maximumf %33, %34 : vector<8x384xf32>
    %c1 = arith.constant 1 : index
    %c0_13 = arith.constant 0 : index
    %c0_14 = arith.constant 0 : index
    %36 = vector.load %arg5[%c1, %c0_13, %c0_14] : memref<4x16x8xbf16, #tpu.memory_space<vmem>>, vector<1x16x8xbf16>
    %37 = vector.shape_cast %36 : vector<1x16x8xbf16> to vector<16x8xbf16>
    %38 = arith.truncf %35 : vector<8x384xf32> to vector<8x384xbf16>
    %cst_15 = arith.constant dense<0.000000e+00> : vector<16x384xf32>
    %39 = tpu.matmul %37, %38, %cst_15 {dimension_numbers = #tpu.dot_dimension_numbers<[1], [0], [0], [1], [0, 0, 1, 1], [], []>} : vector<16x8xbf16>, vector<8x384xbf16>, vector<16x384xf32> -> vector<16x384xf32>
    %40 = arith.addf %17, %39 : vector<16x384xf32>
    %41 = vector.broadcast %2 : vector<1x384xf32> to vector<8x384xf32>
    %42 = arith.addf %35, %41 : vector<8x384xf32>
    %c1_i32_16 = arith.constant 1 : i32
    %43 = tpu.dynamic_rotate %42 by %c1_i32_16 dim 1 : vector<8x384xf32>, i32 -> vector<8x384xf32>
    %44 = arith.maximumf %42, %43 : vector<8x384xf32>
    %c383_i32_17 = arith.constant 383 : i32
    %45 = tpu.dynamic_rotate %42 by %c383_i32_17 dim 1 : vector<8x384xf32>, i32 -> vector<8x384xf32>
    %46 = arith.maximumf %44, %45 : vector<8x384xf32>
    %c2_i32_18 = arith.constant 2 : i32
    %47 = tpu.dynamic_rotate %42 by %c2_i32_18 dim 1 : vector<8x384xf32>, i32 -> vector<8x384xf32>
    %48 = arith.maximumf %46, %47 : vector<8x384xf32>
    %c382_i32_19 = arith.constant 382 : i32
    %49 = tpu.dynamic_rotate %42 by %c382_i32_19 dim 1 : vector<8x384xf32>, i32 -> vector<8x384xf32>
    %50 = arith.maximumf %48, %49 : vector<8x384xf32>
    %c18_i32_20 = arith.constant 18 : i32
    %51 = tpu.dynamic_rotate %50 by %c18_i32_20 dim 1 : vector<8x384xf32>, i32 -> vector<8x384xf32>
    %52 = arith.maximumf %50, %51 : vector<8x384xf32>
    %c366_i32_21 = arith.constant 366 : i32
    %53 = tpu.dynamic_rotate %50 by %c366_i32_21 dim 1 : vector<8x384xf32>, i32 -> vector<8x384xf32>
    %54 = arith.maximumf %52, %53 : vector<8x384xf32>
    %c36_i32_22 = arith.constant 36 : i32
    %55 = tpu.dynamic_rotate %50 by %c36_i32_22 dim 1 : vector<8x384xf32>, i32 -> vector<8x384xf32>
    %56 = arith.maximumf %54, %55 : vector<8x384xf32>
    %c348_i32_23 = arith.constant 348 : i32
    %57 = tpu.dynamic_rotate %50 by %c348_i32_23 dim 1 : vector<8x384xf32>, i32 -> vector<8x384xf32>
    %58 = arith.maximumf %56, %57 : vector<8x384xf32>
    %c2 = arith.constant 2 : index
    %c0_24 = arith.constant 0 : index
    %c0_25 = arith.constant 0 : index
    %59 = vector.load %arg5[%c2, %c0_24, %c0_25] : memref<4x16x8xbf16, #tpu.memory_space<vmem>>, vector<1x16x8xbf16>
    %60 = vector.shape_cast %59 : vector<1x16x8xbf16> to vector<16x8xbf16>
    %61 = arith.truncf %58 : vector<8x384xf32> to vector<8x384xbf16>
    %cst_26 = arith.constant dense<0.000000e+00> : vector<16x384xf32>
    %62 = tpu.matmul %60, %61, %cst_26 {dimension_numbers = #tpu.dot_dimension_numbers<[1], [0], [0], [1], [0, 0, 1, 1], [], []>} : vector<16x8xbf16>, vector<8x384xbf16>, vector<16x384xf32> -> vector<16x384xf32>
    %63 = arith.addf %40, %62 : vector<16x384xf32>
    %64 = vector.broadcast %2 : vector<1x384xf32> to vector<8x384xf32>
    %65 = arith.addf %58, %64 : vector<8x384xf32>
    %c1_i32_27 = arith.constant 1 : i32
    %66 = tpu.dynamic_rotate %65 by %c1_i32_27 dim 1 : vector<8x384xf32>, i32 -> vector<8x384xf32>
    %67 = arith.maximumf %65, %66 : vector<8x384xf32>
    %c383_i32_28 = arith.constant 383 : i32
    %68 = tpu.dynamic_rotate %65 by %c383_i32_28 dim 1 : vector<8x384xf32>, i32 -> vector<8x384xf32>
    %69 = arith.maximumf %67, %68 : vector<8x384xf32>
    %c2_i32_29 = arith.constant 2 : i32
    %70 = tpu.dynamic_rotate %65 by %c2_i32_29 dim 1 : vector<8x384xf32>, i32 -> vector<8x384xf32>
    %71 = arith.maximumf %69, %70 : vector<8x384xf32>
    %c382_i32_30 = arith.constant 382 : i32
    %72 = tpu.dynamic_rotate %65 by %c382_i32_30 dim 1 : vector<8x384xf32>, i32 -> vector<8x384xf32>
    %73 = arith.maximumf %71, %72 : vector<8x384xf32>
    %c18_i32_31 = arith.constant 18 : i32
    %74 = tpu.dynamic_rotate %73 by %c18_i32_31 dim 1 : vector<8x384xf32>, i32 -> vector<8x384xf32>
    %75 = arith.maximumf %73, %74 : vector<8x384xf32>
    %c366_i32_32 = arith.constant 366 : i32
    %76 = tpu.dynamic_rotate %73 by %c366_i32_32 dim 1 : vector<8x384xf32>, i32 -> vector<8x384xf32>
    %77 = arith.maximumf %75, %76 : vector<8x384xf32>
    %c36_i32_33 = arith.constant 36 : i32
    %78 = tpu.dynamic_rotate %73 by %c36_i32_33 dim 1 : vector<8x384xf32>, i32 -> vector<8x384xf32>
    %79 = arith.maximumf %77, %78 : vector<8x384xf32>
    %c348_i32_34 = arith.constant 348 : i32
    %80 = tpu.dynamic_rotate %73 by %c348_i32_34 dim 1 : vector<8x384xf32>, i32 -> vector<8x384xf32>
    %81 = arith.maximumf %79, %80 : vector<8x384xf32>
    %c3 = arith.constant 3 : index
    %c0_35 = arith.constant 0 : index
    %c0_36 = arith.constant 0 : index
    %82 = vector.load %arg5[%c3, %c0_35, %c0_36] : memref<4x16x8xbf16, #tpu.memory_space<vmem>>, vector<1x16x8xbf16>
    %83 = vector.shape_cast %82 : vector<1x16x8xbf16> to vector<16x8xbf16>
    %84 = arith.truncf %81 : vector<8x384xf32> to vector<8x384xbf16>
    %cst_37 = arith.constant dense<0.000000e+00> : vector<16x384xf32>
    %85 = tpu.matmul %83, %84, %cst_37 {dimension_numbers = #tpu.dot_dimension_numbers<[1], [0], [0], [1], [0, 0, 1, 1], [], []>} : vector<16x8xbf16>, vector<8x384xbf16>, vector<16x384xf32> -> vector<16x384xf32>
    %86 = arith.addf %63, %85 : vector<16x384xf32>
    %c0_38 = arith.constant 0 : index
    %c0_39 = arith.constant 0 : index
    %87 = vector.load %arg6[%c0_38, %c0_39] : memref<16x1xf32, #tpu.memory_space<vmem>>, vector<16x1xf32>
    %88 = vector.broadcast %87 : vector<16x1xf32> to vector<16x384xf32>
    %89 = arith.addf %86, %88 : vector<16x384xf32>
    %90 = arith.negf %89 : vector<16x384xf32>
    %91 = math.exp %90 : vector<16x384xf32>
    %cst_40 = arith.constant 1.000000e+00 : f32
    %92 = vector.broadcast %cst_40 : f32 to vector<16x384xf32>
    %93 = arith.addf %92, %91 : vector<16x384xf32>
    %94 = arith.divf %92, %93 : vector<16x384xf32>
    %95 = arith.mulf %89, %94 : vector<16x384xf32>
    %c0_41 = arith.constant 0 : index
    %c0_42 = arith.constant 0 : index
    %c0_43 = arith.constant 0 : index
    %96 = vector.load %arg7[%c0_41, %c0_42, %c0_43] : memref<1x16x384xf32, #tpu.memory_space<vmem>>, vector<1x16x384xf32>
    %97 = vector.shape_cast %96 : vector<1x16x384xf32> to vector<16x384xf32>
    %98 = vector.shape_cast %95 : vector<16x384xf32> to vector<1x16x384xf32>
    tpu.vector_store %arg7[%c0_41, %c0_42, %c0_43], %98 {strides = array<i32>} : memref<1x16x384xf32, #tpu.memory_space<vmem>>, vector<1x16x384xf32>,
    return
  }
  func.func @transform_0(%arg0: i32) -> (i32, i32, i32) {
    %c0_i32 = arith.constant 0 : i32
    %c0_i32_0 = arith.constant 0 : i32
    %c0_i32_1 = arith.constant 0 : i32
    return %arg0, %c0_i32, %c0_i32_0 : i32, i32, i32
  }
  func.func @transform_1(%arg0: i32) -> (i32, i32) {
    %c0_i32 = arith.constant 0 : i32
    %c0_i32_0 = arith.constant 0 : i32
    %c0_i32_1 = arith.constant 0 : i32
    return %c0_i32, %c0_i32_0 : i32, i32
  }
  func.func @transform_2(%arg0: i32) -> (i32, i32) {
    %c0_i32 = arith.constant 0 : i32
    %c0_i32_0 = arith.constant 0 : i32
    %c0_i32_1 = arith.constant 0 : i32
    return %c0_i32, %c0_i32_0 : i32, i32
  }
  func.func @transform_3(%arg0: i32) -> (i32, i32) {
    %c0_i32 = arith.constant 0 : i32
    %c0_i32_0 = arith.constant 0 : i32
    %c0_i32_1 = arith.constant 0 : i32
    return %c0_i32, %c0_i32_0 : i32, i32
  }
  func.func @transform_4(%arg0: i32) -> (i32, i32, i32) {
    %c0_i32 = arith.constant 0 : i32
    %c0_i32_0 = arith.constant 0 : i32
    %c0_i32_1 = arith.constant 0 : i32
    %c0_i32_2 = arith.constant 0 : i32
    return %c0_i32, %c0_i32_0, %c0_i32_1 : i32, i32, i32
  }
  func.func @transform_5(%arg0: i32) -> (i32, i32) {
    %c0_i32 = arith.constant 0 : i32
    %c0_i32_0 = arith.constant 0 : i32
    %c0_i32_1 = arith.constant 0 : i32
    return %c0_i32, %c0_i32_0 : i32, i32
  }
  func.func @transform_6(%arg0: i32) -> (i32, i32, i32) {
    %c0_i32 = arith.constant 0 : i32
    %c0_i32_0 = arith.constant 0 : i32
    %c0_i32_1 = arith.constant 0 : i32
    return %arg0, %c0_i32, %c0_i32_0 : i32, i32, i32
  }
}

</mosaic_0001>

<bundles_post_ra>
// kernel: tpu_custom_call.1
= control target key start
LH: loop header
LB: loop body
LE: loop exit
PB: predicated region body
PF: predicated region fallthrough
CT: control target
= control target key end

     0   :  { %11 = vsyncpa [#allocation3], 0  ;;  %s1970_s0 = inlined_call_operand.vmem [shape: bf16[2,16,384], index: 0, kind: input, shape index: {}]   ;;  %s1971_s1 = inlined_call_operand.vmem [shape: f32[1,384], index: 1, kind: input, shape index: {}]   ;;  %s1972_s2 = inlined_call_operand.vmem [shape: bf16[8,16], index: 2, kind: input, shape index: {}]   ;;  %s1973_s3 = inlined_call_operand.vmem [shape: f32[8,1], index: 3, kind: input, shape index: {}]   ;;  %s1974_s4 = inlined_call_operand.vmem [shape: bf16[4,16,8], index: 4, kind: input, shape index: {}]   ;;  %s1975_s5 = inlined_call_operand.vmem [shape: f32[16,1], index: 5, kind: input, shape index: {}]   ;;  %s1976_s6 = inlined_call_operand.hbm [shape: f32[2,16,384], index: 6, kind: output, shape index: {}]  }
   0x1   :  { %13 = vsyncpa [#allocation3 + $0x1], 0  ;;  %s1505_s21 = smov 0   ;;  %s1507_s22 = smov 0  }
   0x2   :  { %s1509_s23 = smov 0   ;;  %s1511_s24 = smov 0  }
   0x3 LB: > { %s1526_s25 = sadd.s32 4294967295, %s1457_s24   ;;  %s1191_s26 = sadd.s32 4294967294, %s1457_s24   ;;  %s1457_s24 = sphi %s1511_s24, %s1988_s24   ;;  %s1453_s23 = sphi %s1509_s23, %s1987_s23   ;;  %s1449_s22 = sphi %s1507_s22, %s1986_s22   ;;  %s1445_s21 = sphi %s1505_s21, %s1985_s21  }
   0x4   : > { %s1530_s27 = sadd.s32 1, %s1457_s24   ;;  %s157_s28 = sadd.s32 1, %s1453_s23 }
   0x5   : > { %s154_s29 = ssub.s32 %s1457_s24, %s1530_s27  ;;  %p167_p0 = scmp.ne.s32.totalorder %s1453_s23, %s1449_s22 }
   0x6   : > { %p155_p1 = scmp.eq.s32.totalorder %s154_s29, 0  ;;  %p168_p2 = scmp.eq.s32.totalorder %s1526_s25, 1 }
   0x7   : > { %p173_p3 = scmp.ne.s32.totalorder %s1449_s22, %s1445_s21  ;;  %p174_p4 = scmp.eq.s32.totalorder %s1191_s26, 1 }
   0x8   : > { %s1541_s30 = scalar_select %p155_p1, %s1453_s23, %s157_s28  }
   0x9   : > { %p1543_p5 = por %p168_p2, %p167_p0  ;;  %p1547_p6 = por %p174_p4, %p173_p3 }
   0xa   : > { %p1194_p7 = scmp.ge.s32.totalorder %s1457_s24, 1  ;;  %p215_p8 = scmp.lt.s32.totalorder %s1457_s24, 3 }
   0xc   : > { %p216_p9 = pnand %p1194_p7, %p215_p8 }
   0xd   : > { %p245_p10 = scmp.lt.s32.totalorder (!%p216_p9), %s1526_s25, 1  ;;  %s1460_s20 = smov (!%p216_p9), 127  }
   0xe   : > { %219 = sbr.rel (%p216_p9) target bundleno = 1224 (0x4c8), region = 44  ;;  %s1461_s26 = smov (!%p216_p9), 1  }
   0xf   : > { %s1462_s28 = smov (!%p216_p9), 2   ;;  %s1463_s29 = smov (!%p216_p9), 126  }
  0x10   : > { %s1464_s9 = smov (!%p216_p9), 18   ;;  %s1465_s10 = smov (!%p216_p9), 110  }
  0x11   : > { %s1266_s13 = smul.u32 (!%p216_p9), 48, %s1526_s25 }
  0x13   : > { %v257_v0 = vld [vmem:[%s1973_s3] sm:$0xff]  ;;  %v1459_v1 = vmov 0   ;;  %s246_s11 = scalar_select %p245_p10, %s1526_s25, 1  ;;  %vm279_vm0 = vcmask 130048   ;;  %vm518_vm9 = vcmask 1043456  }
  0x14   : > { %1317 = vset.pattern.permute.xlu0 %v1459_v1  ;;  %1358 = vset.pattern.permute.xlu2 %v1459_v1  ;;  %v256_v11 = vld [vmem:[%s1972_s2] sm:$0xf] }
  0x15   : > { %260 = vperm.xlu0 %1317, %v257_v0   ;;  %s1265_s12 = smul.u32 24, %s246_s11  ;;  %v255_v36 = vld [vmem:[%s1971_s1] sm:$0x7]  ;;  %s1466_s11 = smov 36  }
  0x16   : > { %v1570_v46 = vperm.slane %v255_v36, 0  ;;  %v1572_v52 = vperm.slane %v255_v36, 1 }
  0x17   : > { %s249_s15 = scalar_lea.vmem %s1970_s0, %s1265_s12  ;;  %s1467_s12 = smov 92  }
  0x18   : > { %v1198_v2 = vld [vmem:[%s249_s15] sm:$0xf]  ;;  %v1258_v3 = vld [vmem:[%s249_s15 + $0x8] sm:$0xf0]  ;;  %v1257_v4 = vld [vmem:[%s249_s15 + $0x4] sm:$0xf] }
  0x19   : > { %v1199_v5 = vor.u32 %v1258_v3, %v1198_v2  ;;  %v1200_v6 = vld [vmem:[%s249_s15 + $0xc] sm:$0xf0]  ;;  %v1206_v7 = vld [vmem:[%s249_s15 + $0x8] sm:$0xf]  ;;  %v1259_v8 = vld [vmem:[%s249_s15 + $0x10] sm:$0xf0]  ;;  %s1125_s15 = scalar_lea.hbm %s1976_s6, %s1266_s13 }
  0x1a   : > { %v1203_v9 = vor.u32 %v1257_v4, %v1200_v6  ;;  %v1207_v10 = vor.u32 %v1259_v8, %v1206_v7  ;;  %v1583_v6 = vperm.slane %v255_v36, 2  ;;  %s1128_s17 = sshll.u32 %s1125_s15, 4  ;;  %s1129_s17 = int_to_ptr.hbm [resolvable:$true] %s1128_s17 }
  0x1b   : > { %290 = vmatpush.bf16.msra.mxu0 %v1199_v5  ;;  %s1409_s19 = sshra.s32 %s1129_s17, 4  ;;  %s1410_s19 = int_to_ptr.hbm [resolvable:$true] %s1409_s19 }
  0x1c   : > { %303 = vmatpush.bf16.msra.mxu1 %v1203_v9  ;;  %316 = vmatpush.bf16.msra.mxu2 %v1207_v10  ;;  %p1416_p0 = scmp.lt.s32.totalorder %s1410_s19, %s1976_s6 }
  0x1e   : > { %1208 = vmatmul.msk.bf16.vlgmr.msra.gmra.mxu0 %vm279_vm0, %v256_v11 }
  0x1f   : > { %1209 = vmatmul.msk.bf16.vlgmr.msra.gmra.mxu1 %vm279_vm0, %v256_v11  ;;  %1210 = vmatmul.msk.bf16.vlgmr.msra.gmra.mxu2 %vm279_vm0, %v256_v11 }
  0x87   : > { %v261_v12 = vpop.permute.xlu0 %260 }
  0x9b   : > { %v292_v13 = vpop.f32.mrf.mxu0 }
  0x9c   : > { %v293_v14 = vadd.f32 %v292_v13, %v261_v12  ;;  %v305_v15 = vpop.f32.mrf.mxu1  ;;  %v403_v13 = vlaneseq }
  0x9d   : > { %v306_v16 = vadd.f32 %v305_v15, %v261_v12 }
  0x9e   : > { %v1211_v17 = vmul.f32 -1.442695, %v293_v14 }
  0x9f   : > { %v1212_v18 = vmul.f32 -1.442695, %v306_v16 }
  0xa0   : > { %1359 = vpow2.f32 %v1211_v17 }
  0xa1   : > { %1361 = vpow2.f32 %v1212_v18 }
  0xa2   : > { %v318_v19 = vpop.f32.mrf.mxu2 }
  0xa3   : > { %v1564_v20 = vadd.f32 %v318_v19, %v261_v12  ;;  %v294_v21 = vpop.f32.mrf.mxu0 }
  0xa4   : > { %v307_v22 = vpop.f32.mrf.mxu1 }
  0xa5   : > { %v1213_v23 = vmul.f32 -1.442695, %v1564_v20 }
  0xa6   : > { %v1360_v24 = vpop.eup %1359 }
  0xa7   : > { %v1362_v25 = vpop.eup %1361  ;;  %v331_v26 = vadd.f32 1.0, %v1360_v24  ;;  %1363 = vpow2.f32 %v1213_v23 }
  0xa8   : > { %v332_v27 = vadd.f32 1.0, %v1362_v25 }
  0xa9   : > { %1365 = vrcp.f32 %v331_v26  ;;  %v345_v37 = vand.u32 2147483648, %v331_v26  ;;  %v343_v40 = vand.u32 2147483647, %v331_v26  ;;  %vm339_vm3 = vweird.f32 %v331_v26 }
  0xaa   : > { %1367 = vrcp.f32 %v332_v27  ;;  %v320_v28 = vpop.f32.mrf.mxu2  ;;  %v360_v41 = vand.u32 2147483648, %v332_v27  ;;  %v358_v43 = vand.u32 2147483647, %v332_v27  ;;  %vm354_vm5 = vweird.f32 %v332_v27 }
  0xab   : > { %v346_v47 = vor.u32 1.1754944e-38, %v345_v37  ;;  %vm344_vm6 = vcmp.eq.f32.partialorder %v343_v40, 8.507059e+37 }
  0xac   : > { %v361_v51 = vor.u32 1.1754944e-38, %v360_v41  ;;  %vm359_vm8 = vcmp.eq.f32.partialorder %v358_v43, 8.507059e+37 }
  0xad   : > { %v1364_v29 = vpop.eup %1363 }
  0xae   : > { %v333_v30 = vadd.f32 1.0, %v1364_v29 }
  0xaf   : > { %v1366_v31 = vpop.eup %1365 }
  0xb0   : > { %v1368_v32 = vpop.eup %1367  ;;  %v335_v33 = vmul.f32 %v1366_v31, %v331_v26  ;;  %1369 = vrcp.f32 %v333_v30  ;;  %vm340_vm1 = vweird.f32 %v1366_v31  ;;  %v375_v58 = vand.u32 2147483648, %v333_v30 }
  0xb1   : > { %v350_v34 = vmul.f32 %v1368_v32, %v332_v27  ;;  %vm355_vm2 = vweird.f32 %v1368_v32  ;;  %vm341_vm4 = vmor %vm339_vm3, %vm340_vm1  ;;  %v373_v61 = vand.u32 2147483647, %v333_v30  ;;  %vm369_vm11 = vweird.f32 %v333_v30 }
  0xb2   : > { %v336_v35 = vsub.f32 1.0, %v335_v33  ;;  %vm356_vm7 = vmor %vm354_vm5, %vm355_vm2  ;;  %v376_v2 = vor.u32 1.1754944e-38, %v375_v58 }
  0xb3   : > { %v351_v38 = vsub.f32 1.0, %v350_v34  ;;  %vm374_vm13 = vcmp.eq.f32.partialorder %v373_v61, 8.507059e+37 }
  0xb4   : > { %v337_v39 = vmul.f32 %v1366_v31, %v336_v35 }
  0xb5   : > { %v352_v42 = vmul.f32 %v1368_v32, %v351_v38 }
  0xb6   : > { %v1370_v44 = vpop.eup %1369  ;;  %v338_v45 = vadd.f32 %v1366_v31, %v337_v39 }
  0xb7   : > { %v353_v48 = vadd.f32 %v1368_v32, %v352_v42  ;;  %v365_v49 = vmul.f32 %v1370_v44, %v333_v30  ;;  %vm370_vm10 = vweird.f32 %v1370_v44 }
  0xb8   : > { %v342_v50 = vsel %vm341_vm4, %v1366_v31, %v338_v45  ;;  %vm371_vm12 = vmor %vm369_vm11, %vm370_vm10 }
  0xb9   : > { %v347_v53 = vsel %vm344_vm6, %v346_v47, %v342_v50  ;;  %v357_v54 = vsel %vm356_vm7, %v1368_v32, %v353_v48  ;;  %v366_v55 = vsub.f32 1.0, %v365_v49  ;;  %vm514_vm6 = vcmask 64512  }
  0xba   : > { %v379_v56 = vmul.f32 %v347_v53, %v293_v14  ;;  %v362_v57 = vsel %vm359_vm8, %v361_v51, %v357_v54 }
  0xbb   : > { %v1574_v59 = vmul.f32 %v362_v57, %v306_v16  ;;  %v367_v60 = vmul.f32 %v1370_v44, %v366_v55  ;;  %v1599_v16 = vand.u32 127, %v403_v13 }
  0xbc   : > { %v394_v62 = vadd.f32 %v1570_v46, %v379_v56  ;;  %v384_v63 = vpack.c.bf16 %v379_v56, %v379_v56 }
  0xbd   : > { %v395_v0 = vadd.f32 %v1572_v52, %v1574_v59  ;;  %v368_v1 = vadd.f32 %v1370_v44, %v367_v60  ;;  %vm405_vm14 = vcmp.lt.s32.totalorder %v1599_v16, 1  ;;  %vm418_vm15 = vcmp.lt.s32.totalorder %v1599_v16, 127 }
  0xbe   : > { %412 = vrot.lane.b32.xlu2 %v394_v62, %s1460_s20  ;;  %397 = vrot.lane.b32.xlu0 %v394_v62, %s1461_s26  ;;  %v579_v3 = vsel %vm518_vm9, %v384_v63, 0  ;;  %vm431_vm0 = vcmp.lt.s32.totalorder %v1599_v16, 2  ;;  %vm444_vm1 = vcmp.lt.s32.totalorder %v1599_v16, 126  ;;  %vm457_vm2 = vcmp.lt.s32.totalorder %v1599_v16, 18 }
  0xbf   : > { %v372_v4 = vsel %vm371_vm12, %v1370_v44, %v368_v1  ;;  %399 = vrot.lane.b32.xlu1 %v395_v0, %s1461_s26  ;;  %594 = vmatpush.bf16.msrb.mxu2 %v579_v3  ;;  %vm470_vm3 = vcmp.lt.s32.totalorder %v1599_v16, 110  ;;  %vm483_vm4 = vcmp.lt.s32.totalorder %v1599_v16, 36  ;;  %vm496_vm5 = vcmp.lt.s32.totalorder %v1599_v16, 92 }
  0xc0   : > { %v377_v5 = vsel %vm374_vm13, %v376_v2, %v372_v4 }
  0xc1   : > { %v1586_v7 = vmul.f32 %v377_v5, %v1564_v20 }
  0xc3   : > { %v396_v8 = vadd.f32 %v1583_v6, %v1586_v7 }
  0xc6   : > { %416 = vrot.lane.b32.xlu0 %v396_v8, %s1460_s20  ;;  %414 = vrot.lane.b32.xlu2 %v395_v0, %s1460_s20 }
  0xc7   : > { %425 = vrot.lane.b32.xlu1 %v394_v62, %s1462_s28 }
  0xce   : > { %429 = vrot.lane.b32.xlu0 %v396_v8, %s1462_s28  ;;  %427 = vrot.lane.b32.xlu2 %v395_v0, %s1462_s28 }
  0xcf   : > { %401 = vrot.lane.b32.xlu1 %v396_v8, %s1461_s26 }
  0xd6   : > { %442 = vrot.lane.b32.xlu0 %v396_v8, %s1463_s29  ;;  %440 = vrot.lane.b32.xlu2 %v395_v0, %s1463_s29 }
  0xd7   : > { %438 = vrot.lane.b32.xlu1 %v394_v62, %s1463_s29 }
 0x118   : > { %v413_v9 = vpop.permute.xlu2 %412 }
 0x120   : > { %v415_v12 = vpop.permute.xlu2 %414 }
 0x121   : > { %v420_v27 = vsel %vm418_vm15, %v413_v9, %v415_v12 }
 0x128   : > { %v428_v17 = vpop.permute.xlu2 %427 }
 0x130   : > { %v398_v10 = vpop.permute.xlu0 %397  ;;  %v441_v33 = vpop.permute.xlu2 %440 }
 0x131   : > { %v400_v11 = vpop.permute.xlu1 %399 }
 0x132   : > { %v407_v18 = vsel %vm405_vm14, %v398_v10, %v400_v11 }
 0x133   : > { %v410_v22 = vmax.f32 %v395_v0, %v407_v18 }
 0x138   : > { %v417_v14 = vpop.permute.xlu0 %416 }
 0x139   : > { %v426_v15 = vpop.permute.xlu1 %425  ;;  %v419_v20 = vsel %vm418_vm15, %v415_v12, %v417_v14  ;;  %v421_v28 = vsel %vm418_vm15, %v417_v14, %v413_v9 }
 0x13a   : > { %v423_v29 = vmax.f32 %v410_v22, %v419_v20  ;;  %v433_v32 = vsel %vm431_vm0, %v426_v15, %v428_v17 }
 0x13c   : > { %v436_v34 = vmax.f32 %v423_v29, %v433_v32 }
 0x140   : > { %v430_v19 = vpop.permute.xlu0 %429 }
 0x141   : > { %v402_v21 = vpop.permute.xlu1 %401  ;;  %v432_v35 = vsel %vm431_vm0, %v428_v17, %v430_v19  ;;  %v434_v36 = vsel %vm431_vm0, %v430_v19, %v426_v15 }
 0x142   : > { %v406_v23 = vsel %vm405_vm14, %v400_v11, %v402_v21  ;;  %v408_v24 = vsel %vm405_vm14, %v402_v21, %v398_v10 }
 0x143   : > { %v409_v25 = vmax.f32 %v394_v62, %v408_v24  ;;  %v411_v26 = vmax.f32 %v396_v8, %v406_v23 }
 0x145   : > { %v422_v30 = vmax.f32 %v409_v25, %v420_v27  ;;  %v424_v31 = vmax.f32 %v411_v26, %v421_v28  ;;  %v386_v25 = vpack.c.bf16 %v1586_v7, %v1586_v7  ;;  %v385_v26 = vpack.c.bf16 %v1574_v59, %v1574_v59 }
 0x147   : > { %v435_v39 = vmax.f32 %v422_v30, %v434_v36  ;;  %v437_v40 = vmax.f32 %v424_v31, %v432_v35  ;;  %v585_v35 = vsel %vm518_vm9, %v386_v25, 0 }
 0x148   : > { %v443_v37 = vpop.permute.xlu0 %442 }
 0x149   : > { %v445_v38 = vsel %vm444_vm1, %v441_v33, %v443_v37  ;;  %v439_v41 = vpop.permute.xlu1 %438 }
 0x14a   : > { %v449_v42 = vmax.f32 %v436_v34, %v445_v38  ;;  %v446_v43 = vsel %vm444_vm1, %v439_v41, %v441_v33  ;;  %v447_v44 = vsel %vm444_vm1, %v443_v37, %v439_v41  ;;  %v582_v34 = vsel %vm518_vm9, %v385_v26, 0 }
 0x14b   : > { %v448_v45 = vmax.f32 %v435_v39, %v446_v43  ;;  %v450_v47 = vmax.f32 %v437_v40, %v447_v44 }
 0x14c   : > { %453 = vrot.lane.b32.xlu2 %v449_v42, %s1464_s9 }
 0x14d   : > { %455 = vrot.lane.b32.xlu0 %v450_v47, %s1464_s9  ;;  %451 = vrot.lane.b32.xlu1 %v448_v45, %s1464_s9 }
 0x154   : > { %466 = vrot.lane.b32.xlu2 %v449_v42, %s1465_s10 }
 0x155   : > { %468 = vrot.lane.b32.xlu0 %v450_v47, %s1465_s10  ;;  %464 = vrot.lane.b32.xlu1 %v448_v45, %s1465_s10 }
 0x15c   : > { %479 = vrot.lane.b32.xlu2 %v449_v42, %s1466_s11 }
 0x15d   : > { %481 = vrot.lane.b32.xlu0 %v450_v47, %s1466_s11  ;;  %477 = vrot.lane.b32.xlu1 %v448_v45, %s1466_s11 }
 0x164   : > { %492 = vrot.lane.b32.xlu2 %v449_v42, %s1467_s12 }
 0x165   : > { %494 = vrot.lane.b32.xlu0 %v450_v47, %s1467_s12  ;;  %490 = vrot.lane.b32.xlu1 %v448_v45, %s1467_s12 }
 0x1a6   : > { %v454_v48 = vpop.permute.xlu2 %453 }
 0x1ae   : > { %v467_v51 = vpop.permute.xlu2 %466 }
 0x1b6   : > { %v480_v55 = vpop.permute.xlu2 %479 }
 0x1be   : > { %v493_v12 = vpop.permute.xlu2 %492 }
 0x1bf   : > { %v456_v49 = vpop.permute.xlu0 %455  ;;  %v452_v50 = vpop.permute.xlu1 %451 }
 0x1c0   : > { %v458_v58 = vsel %vm457_vm2, %v454_v48, %v456_v49  ;;  %v459_v60 = vsel %vm457_vm2, %v452_v50, %v454_v48  ;;  %v460_v61 = vsel %vm457_vm2, %v456_v49, %v452_v50 }
 0x1c1   : > { %v463_v1 = vmax.f32 %v450_v47, %v458_v58  ;;  %v461_v2 = vmax.f32 %v448_v45, %v460_v61  ;;  %v462_v3 = vmax.f32 %v449_v42, %v459_v60 }
 0x1c7   : > { %v469_v53 = vpop.permute.xlu0 %468  ;;  %v465_v54 = vpop.permute.xlu1 %464 }
 0x1c8   : > { %v471_v62 = vsel %vm470_vm3, %v467_v51, %v469_v53  ;;  %v472_v63 = vsel %vm470_vm3, %v465_v54, %v467_v51  ;;  %v473_v0 = vsel %vm470_vm3, %v469_v53, %v465_v54 }
 0x1c9   : > { %v475_v9 = vmax.f32 %v462_v3, %v471_v62  ;;  %v474_v10 = vmax.f32 %v461_v2, %v472_v63  ;;  %v476_v11 = vmax.f32 %v463_v1, %v473_v0 }
 0x1cf   : > { %v482_v56 = vpop.permute.xlu0 %481  ;;  %v478_v57 = vpop.permute.xlu1 %477 }
 0x1d0   : > { %v484_v4 = vsel %vm483_vm4, %v480_v55, %v482_v56  ;;  %v485_v5 = vsel %vm483_vm4, %v478_v57, %v480_v55  ;;  %v486_v8 = vsel %vm483_vm4, %v482_v56, %v478_v57 }
 0x1d1   : > { %v489_v13 = vmax.f32 %v476_v11, %v484_v4  ;;  %v487_v14 = vmax.f32 %v474_v10, %v486_v8  ;;  %v488_v15 = vmax.f32 %v475_v9, %v485_v5 }
 0x1d7   : > { %v495_v17 = vpop.permute.xlu0 %494  ;;  %v491_v18 = vpop.permute.xlu1 %490 }
 0x1d8   : > { %v497_v19 = vsel %vm496_vm5, %v493_v12, %v495_v17  ;;  %v498_v20 = vsel %vm496_vm5, %v491_v18, %v493_v12  ;;  %v499_v21 = vsel %vm496_vm5, %v495_v17, %v491_v18 }
 0x1d9   : > { %v501_v22 = vmax.f32 %v488_v15, %v497_v19  ;;  %v500_v23 = vmax.f32 %v487_v14, %v498_v20  ;;  %v502_v24 = vmax.f32 %v489_v13, %v499_v21  ;;  %v1261_v14 = vld [vmem:[%s1974_s4 + $0x8] sm:$0xff] }
 0x1db   : > { %v630_v27 = vadd.f32 %v501_v22, %v1572_v52  ;;  %v629_v28 = vadd.f32 %v500_v23, %v1570_v46  ;;  %v631_v29 = vadd.f32 %v502_v24, %v1583_v6  ;;  %v506_v30 = vpack.c.bf16 %v500_v23, %v500_v23 }
 0x1dc   : > { %v507_v31 = vpack.c.bf16 %v501_v22, %v501_v22  ;;  %v508_v32 = vpack.c.bf16 %v502_v24, %v502_v24 }
 0x1dd   : > { %634 = vrot.lane.b32.xlu2 %v630_v27, %s1461_s26  ;;  %636 = vrot.lane.b32.xlu0 %v631_v29, %s1461_s26  ;;  %v520_v33 = vsel %vm518_vm9, %v506_v30, 0 }
 0x1de   : > { %632 = vrot.lane.b32.xlu1 %v629_v28, %s1461_s26  ;;  %535 = vmatpush.bf16.msra.mxu3 %v520_v33  ;;  %v523_v59 = vsel %vm518_vm9, %v507_v31, 0  ;;  %v526_v7 = vsel %vm518_vm9, %v508_v32, 0 }
 0x1df   : > { %549 = vmatpush.bf16.msrb.mxu0 %v523_v59  ;;  %563 = vmatpush.bf16.msrb.mxu1 %v526_v7 }
 0x1e1   : > { %1220 = vmatmul.msk.bf16.vlgmr.msra.gmra.mxu3 %vm514_vm6, %v1261_v14 }
 0x1e2   : > { %608 = vmatpush.bf16.msrb.mxu3 %v582_v34  ;;  %1221 = vmatmul.msk.bf16.vlgmr.msrb.gmra.mxu0 %vm514_vm6, %v1261_v14 }
 0x1e3   : > { %622 = vmatpush.bf16.msra.mxu0 %v585_v35  ;;  %1222 = vmatmul.msk.bf16.vlgmr.msrb.gmra.mxu1 %vm514_vm6, %v1261_v14 }
 0x1e5   : > { %646 = vrot.lane.b32.xlu2 %v630_v27, %s1460_s20  ;;  %648 = vrot.lane.b32.xlu0 %v631_v29, %s1460_s20 }
 0x1e6   : > { %644 = vrot.lane.b32.xlu1 %v629_v28, %s1460_s20 }
 0x1ed   : > { %658 = vrot.lane.b32.xlu2 %v630_v27, %s1462_s28  ;;  %660 = vrot.lane.b32.xlu0 %v631_v29, %s1462_s28 }
 0x1ee   : > { %656 = vrot.lane.b32.xlu1 %v629_v28, %s1462_s28 }
 0x1f5   : > { %670 = vrot.lane.b32.xlu2 %v630_v27, %s1463_s29  ;;  %672 = vrot.lane.b32.xlu0 %v631_v29, %s1463_s29 }
 0x1f6   : > { %668 = vrot.lane.b32.xlu1 %v629_v28, %s1463_s29 }
 0x237   : > { %v635_v36 = vpop.permute.xlu2 %634 }
 0x23f   : > { %v647_v39 = vpop.permute.xlu2 %646 }
 0x247   : > { %v659_v42 = vpop.permute.xlu2 %658 }
 0x24f   : > { %v637_v37 = vpop.permute.xlu0 %636  ;;  %v671_v63 = vpop.permute.xlu2 %670 }
 0x250   : > { %v633_v38 = vpop.permute.xlu1 %632  ;;  %v638_v47 = vsel %vm405_vm14, %v635_v36, %v637_v37 }
 0x251   : > { %v639_v44 = vsel %vm405_vm14, %v633_v38, %v635_v36  ;;  %v640_v48 = vsel %vm405_vm14, %v637_v37, %v633_v38  ;;  %v643_v54 = vmax.f32 %v631_v29, %v638_v47 }
 0x252   : > { %v642_v50 = vmax.f32 %v630_v27, %v639_v44  ;;  %v641_v55 = vmax.f32 %v629_v28, %v640_v48 }
 0x257   : > { %v649_v40 = vpop.permute.xlu0 %648 }
 0x258   : > { %v645_v41 = vpop.permute.xlu1 %644  ;;  %v650_v49 = vsel %vm418_vm15, %v647_v39, %v649_v40 }
 0x259   : > { %v651_v51 = vsel %vm418_vm15, %v645_v41, %v647_v39  ;;  %v652_v53 = vsel %vm418_vm15, %v649_v40, %v645_v41  ;;  %v654_v57 = vmax.f32 %v642_v50, %v650_v49 }
 0x25a   : > { %v653_v61 = vmax.f32 %v641_v55, %v651_v51  ;;  %v655_v62 = vmax.f32 %v643_v54, %v652_v53 }
 0x25f   : > { %v661_v43 = vpop.permute.xlu0 %660 }
 0x260   : > { %v657_v45 = vpop.permute.xlu1 %656  ;;  %v662_v58 = vsel %vm431_vm0, %v659_v42, %v661_v43 }
 0x261   : > { %v663_v56 = vsel %vm431_vm0, %v657_v45, %v659_v42  ;;  %v664_v60 = vsel %vm431_vm0, %v661_v43, %v657_v45  ;;  %v667_v2 = vmax.f32 %v655_v62, %v662_v58 }
 0x262   : > { %v666_v0 = vmax.f32 %v654_v57, %v663_v56  ;;  %v665_v3 = vmax.f32 %v653_v61, %v664_v60 }
 0x267   : > { %v673_v1 = vpop.permute.xlu0 %672 }
 0x268   : > { %v674_v4 = vsel %vm444_vm1, %v671_v63, %v673_v1  ;;  %v669_v5 = vpop.permute.xlu1 %668 }
 0x269   : > { %v678_v8 = vmax.f32 %v666_v0, %v674_v4  ;;  %v675_v9 = vsel %vm444_vm1, %v669_v5, %v671_v63  ;;  %v676_v10 = vsel %vm444_vm1, %v673_v1, %v669_v5 }
 0x26a   : > { %v677_v11 = vmax.f32 %v665_v3, %v675_v9  ;;  %v679_v12 = vmax.f32 %v667_v2, %v676_v10 }
 0x26b   : > { %682 = vrot.lane.b32.xlu2 %v678_v8, %s1464_s9 }
 0x26c   : > { %684 = vrot.lane.b32.xlu0 %v679_v12, %s1464_s9  ;;  %680 = vrot.lane.b32.xlu1 %v677_v11, %s1464_s9 }
 0x273   : > { %694 = vrot.lane.b32.xlu2 %v678_v8, %s1465_s10 }
 0x274   : > { %696 = vrot.lane.b32.xlu0 %v679_v12, %s1465_s10  ;;  %692 = vrot.lane.b32.xlu1 %v677_v11, %s1465_s10 }
 0x27b   : > { %706 = vrot.lane.b32.xlu2 %v678_v8, %s1466_s11 }
 0x27c   : > { %708 = vrot.lane.b32.xlu0 %v679_v12, %s1466_s11  ;;  %704 = vrot.lane.b32.xlu1 %v677_v11, %s1466_s11 }
 0x283   : > { %718 = vrot.lane.b32.xlu2 %v678_v8, %s1467_s12 }
 0x284   : > { %720 = vrot.lane.b32.xlu0 %v679_v12, %s1467_s12  ;;  %716 = vrot.lane.b32.xlu1 %v677_v11, %s1467_s12 }
 0x2c5   : > { %v683_v13 = vpop.permute.xlu2 %682 }
 0x2cd   : > { %v695_v18 = vpop.permute.xlu2 %694 }
 0x2d5   : > { %v707_v21 = vpop.permute.xlu2 %706 }
 0x2dd   : > { %v719_v37 = vpop.permute.xlu2 %718 }
 0x2de   : > { %v685_v15 = vpop.permute.xlu0 %684  ;;  %v681_v17 = vpop.permute.xlu1 %680 }
 0x2df   : > { %v686_v24 = vsel %vm457_vm2, %v683_v13, %v685_v15  ;;  %v687_v25 = vsel %vm457_vm2, %v681_v17, %v683_v13  ;;  %v688_v26 = vsel %vm457_vm2, %v685_v15, %v681_v17 }
 0x2e0   : > { %v691_v30 = vmax.f32 %v679_v12, %v686_v24  ;;  %v689_v31 = vmax.f32 %v677_v11, %v688_v26  ;;  %v690_v32 = vmax.f32 %v678_v8, %v687_v25 }
 0x2e6   : > { %v697_v19 = vpop.permute.xlu0 %696  ;;  %v693_v20 = vpop.permute.xlu1 %692 }
 0x2e7   : > { %v698_v27 = vsel %vm470_vm3, %v695_v18, %v697_v19  ;;  %v699_v28 = vsel %vm470_vm3, %v693_v20, %v695_v18  ;;  %v700_v29 = vsel %vm470_vm3, %v697_v19, %v693_v20 }
 0x2e8   : > { %v702_v34 = vmax.f32 %v690_v32, %v698_v27  ;;  %v701_v35 = vmax.f32 %v689_v31, %v699_v28  ;;  %v703_v36 = vmax.f32 %v691_v30, %v700_v29 }
 0x2ee   : > { %v709_v22 = vpop.permute.xlu0 %708  ;;  %v705_v23 = vpop.permute.xlu1 %704 }
 0x2ef   : > { %v710_v33 = vsel %vm483_vm4, %v707_v21, %v709_v22  ;;  %v711_v59 = vsel %vm483_vm4, %v705_v23, %v707_v21  ;;  %v712_v7 = vsel %vm483_vm4, %v709_v22, %v705_v23 }
 0x2f0   : > { %v715_v38 = vmax.f32 %v703_v36, %v710_v33  ;;  %v713_v39 = vmax.f32 %v701_v35, %v712_v7  ;;  %v714_v40 = vmax.f32 %v702_v34, %v711_v59 }
 0x2f6   : > { %v721_v41 = vpop.permute.xlu0 %720  ;;  %v717_v42 = vpop.permute.xlu1 %716 }
 0x2f7   : > { %v722_v43 = vsel %vm496_vm5, %v719_v37, %v721_v41  ;;  %v723_v44 = vsel %vm496_vm5, %v717_v42, %v719_v37  ;;  %v724_v45 = vsel %vm496_vm5, %v721_v41, %v717_v42  ;;  %v969_v41 = vld [vmem:[%s1975_s5] sm:$0xff] }
 0x2f8   : > { %v726_v47 = vmax.f32 %v714_v40, %v722_v43  ;;  %v725_v48 = vmax.f32 %v713_v39, %v723_v44  ;;  %v727_v49 = vmax.f32 %v715_v38, %v724_v45  ;;  %v970_v38 = vld [vmem:[%s1975_s5 + $0x8] sm:$0xff]  ;;  %v1260_v39 = vld [vmem:[%s1974_s4] sm:$0xff]  ;;  %v1262_v40 = vld [vmem:[%s1974_s4 + $0x10] sm:$0xff] }
 0x2f9   : > { %1227 = vmatmul.msk.bf16.vlgmr.msrb.gmra.mxu2 %vm514_vm6, %v1260_v39  ;;  %1228 = vmatmul.msk.bf16.vlgmr.msrb.gmra.mxu3 %vm514_vm6, %v1260_v39 }
 0x2fa   : > { %v732_v50 = vpack.c.bf16 %v726_v47, %v726_v47  ;;  %v800_v51 = vadd.f32 %v726_v47, %v1572_v52  ;;  %v731_v53 = vpack.c.bf16 %v725_v48, %v725_v48  ;;  %v733_v54 = vpack.c.bf16 %v727_v49, %v727_v49  ;;  %1229 = vmatmul.msk.bf16.vlgmr.msra.gmra.mxu0 %vm514_vm6, %v1260_v39 }
 0x2fb   : > { %v799_v55 = vadd.f32 %v725_v48, %v1570_v46  ;;  %v801_v56 = vadd.f32 %v727_v49, %v1583_v6 }
 0x2fc   : > { %v743_v57 = vsel %vm518_vm9, %v731_v53, 0  ;;  %v746_v58 = vsel %vm518_vm9, %v732_v50, 0  ;;  %v749_v60 = vsel %vm518_vm9, %v733_v54, 0 }
 0x2fd   : > { %806 = vrot.lane.b32.xlu2 %v801_v56, %s1461_s26  ;;  %758 = vmatpush.bf16.msra.mxu1 %v743_v57  ;;  %v1323_v61 = vpack.i.bf16 %v800_v51, %v799_v55 }
 0x2fe   : > { %772 = vmatpush.bf16.msra.mxu2 %v746_v58  ;;  %786 = vmatpush.bf16.msra.mxu3 %v749_v60 }
 0x2ff   : > { %1324 = vrot.lane.b32.xlu0 %v1323_v61, %s1460_s20  ;;  %1319 = vrot.lane.b32.xlu1 %v1323_v61, %s1461_s26 }
 0x300   : > { %1236 = vmatmul.msk.bf16.vlgmr.msra.gmra.mxu1 %vm514_vm6, %v1262_v40 }
 0x305   : > { %1329 = vrot.lane.b32.xlu2 %v1323_v61, %s1462_s28 }
 0x307   : > { %830 = vrot.lane.b32.xlu0 %v801_v56, %s1462_s28  ;;  %818 = vrot.lane.b32.xlu1 %v801_v56, %s1460_s20  ;;  %s1411_s20 = scalar_lea.hbm %s1410_s19, 48 }
 0x308   : > { %p1412_p11 = scmp.ne.s32.totalorder %s1410_s19, %s1411_s20 }
 0x309   : > { %1237 = vmatmul.msk.bf16.vlgmr.msra.gmra.mxu2 %vm514_vm6, %v1262_v40  ;;  %1238 = vmatmul.msk.bf16.vlgmr.msra.gmra.mxu3 %vm514_vm6, %v1262_v40 }
 0x30a   : > { %p1413_p12 = pnand %p1412_p11, %p1543_p5 }
 0x30c   : > { %p1414_p13 = pneg %p1413_p12 }
 0x30d   : > { %842 = vrot.lane.b32.xlu2 %v801_v56, %s1463_s29 }
 0x30f   : > { %1334 = vrot.lane.b32.xlu1 %v1323_v61, %s1463_s29  ;;  %s1415_s29 = scalar_lea.hbm %s1976_s6, 96 }
 0x310   : > { %p1417_p1 = scmp.lt.s32.totalorder %s1415_s29, %s1411_s20 }
 0x312   : > { %p1418_p2 = por %p1417_p1, %p1416_p0 }
 0x314   : > { %p1419_p3 = pnand %p1418_p2, %p1414_p13 }
 0x357   : > { %v807_v46 = vpop.permute.xlu2 %806 }
 0x35f   : > { %v1330_v0 = vpop.permute.xlu2 %1329 }
 0x360   : > { %v1332_v15 = vunpack.i.h.bf16 %v1330_v0  ;;  %v1331_v17 = vunpack.i.l.bf16 %v1330_v0 }
 0x362   : > { %v833_v25 = vsel %vm431_vm0, %v1331_v17, %v1332_v15 }
 0x367   : > { %v843_v28 = vpop.permute.xlu2 %842 }
 0x371   : > { %v1320_v52 = vpop.permute.xlu1 %1319  ;;  %v1325_v6 = vpop.permute.xlu0 %1324 }
 0x372   : > { %v1322_v62 = vunpack.i.h.bf16 %v1320_v52  ;;  %v1321_v63 = vunpack.i.l.bf16 %v1320_v52  ;;  %v1327_v1 = vunpack.i.h.bf16 %v1325_v6  ;;  %v1326_v3 = vunpack.i.l.bf16 %v1325_v6 }
 0x374   : > { %v810_v4 = vsel %vm405_vm14, %v807_v46, %v1321_v63  ;;  %v808_v5 = vsel %vm405_vm14, %v1322_v62, %v807_v46  ;;  %v809_v8 = vsel %vm405_vm14, %v1321_v63, %v1322_v62  ;;  %v821_v20 = vsel %vm418_vm15, %v1326_v3, %v1327_v1 }
 0x375   : > { %v811_v12 = vmax.f32 %v799_v55, %v810_v4  ;;  %v812_v13 = vmax.f32 %v800_v51, %v809_v8  ;;  %v813_v14 = vmax.f32 %v801_v56, %v808_v5 }
 0x377   : > { %v823_v22 = vmax.f32 %v811_v12, %v821_v20 }
 0x379   : > { %v819_v2 = vpop.permute.xlu1 %818  ;;  %v831_v11 = vpop.permute.xlu0 %830 }
 0x37a   : > { %v820_v9 = vsel %vm418_vm15, %v1327_v1, %v819_v2  ;;  %v822_v10 = vsel %vm418_vm15, %v819_v2, %v1326_v3  ;;  %v834_v21 = vsel %vm431_vm0, %v831_v11, %v1331_v17  ;;  %v832_v24 = vsel %vm431_vm0, %v1332_v15, %v831_v11 }
 0x37b   : > { %v824_v18 = vmax.f32 %v812_v13, %v820_v9  ;;  %v825_v19 = vmax.f32 %v813_v14, %v822_v10  ;;  %v835_v29 = vmax.f32 %v823_v22, %v834_v21  ;;  %v1263_v10 = vld [vmem:[%s1974_s4 + $0x18] sm:$0xff] }
 0x37d   : > { %v836_v30 = vmax.f32 %v824_v18, %v833_v25  ;;  %v837_v31 = vmax.f32 %v825_v19, %v832_v24 }
 0x381   : > { %v1335_v23 = vpop.permute.xlu1 %1334 }
 0x382   : > { %v1337_v26 = vunpack.i.h.bf16 %v1335_v23  ;;  %v1336_v27 = vunpack.i.l.bf16 %v1335_v23 }
 0x384   : > { %v844_v32 = vsel %vm444_vm1, %v1337_v26, %v843_v28  ;;  %v845_v33 = vsel %vm444_vm1, %v1336_v27, %v1337_v26  ;;  %v846_v59 = vsel %vm444_vm1, %v843_v28, %v1336_v27  ;;  %v537_v28 = vpop.f32.mrf.mxu3 }
 0x385   : > { %v847_v7 = vmax.f32 %v835_v29, %v845_v33  ;;  %v848_v34 = vmax.f32 %v836_v30, %v844_v32  ;;  %v849_v35 = vmax.f32 %v837_v31, %v846_v59  ;;  %v596_v29 = vpop.f32.mrf.mxu2  ;;  %v551_v30 = vpop.f32.mrf.mxu0 }
 0x386   : > { %v565_v31 = vpop.f32.mrf.mxu1 }
 0x387   : > { %v1343_v36 = vpack.i.bf16 %v849_v35, %v847_v7  ;;  %v1348_v37 = vpack.i.bf16 %v849_v35, %v848_v34 }
 0x389   : > { %1344 = vrot.lane.b32.xlu1 %v1343_v36, %s1465_s10  ;;  %1349 = vrot.lane.b32.xlu2 %v1348_v37, %s1466_s11 }
 0x38a   : > { %1339 = vrot.lane.b32.xlu0 %v1348_v37, %s1464_s9 }
 0x38c   : > { %v539_v16 = vpop.f32.mrf.mxu3 }
 0x38d   : > { %v598_v32 = vpop.f32.mrf.mxu2  ;;  %v553_v59 = vpop.f32.mrf.mxu0 }
 0x391   : > { %1354 = vrot.lane.b32.xlu1 %v1343_v36, %s1467_s12  ;;  %864 = vrot.lane.b32.xlu2 %v848_v34, %s1465_s10  ;;  %s242_s10 = sand.u32 1, %s1449_s22  }
 0x392   : > { %850 = vrot.lane.b32.xlu0 %v847_v7, %s1464_s9  ;;  %s1114_s18 = scalar_lea.sflag [#allocation3], %s242_s10 }
 0x394   : > { %v610_v33 = vpop.f32.mrf.mxu3 }
 0x395   : > { %v624_v36 = vpop.f32.mrf.mxu0 }
 0x396   : > { %v625_v40 = vadd.f32 %v624_v36, %v565_v31 }
 0x399   : > { %888 = vrot.lane.b32.xlu1 %v848_v34, %s1467_s12  ;;  %973 = vperm.xlu2 %1358, %v969_v41  }
 0x39a   : > { %874 = vrot.lane.b32.xlu0 %v847_v7, %s1466_s11  ;;  %s1884_s11 = smul.u32 48, %s242_s10 }
 0x39c   : > { %s1910_s12 = scalar_lea.vmem [#allocation2], %s1884_s11 }
 0x39d   : > { %v626_v41 = vpop.f32.mrf.mxu0  ;;  %s1126_s16 = sshll.u32 %s1910_s12, 4  ;;  %s1127_s16 = int_to_ptr.vmem [resolvable:$true] %s1126_s16 }
 0x3a2   : > { %978 = vperm.xlu0 %1317, %v970_v38  }
 0x3e3   : > { %v1350_v44 = vpop.permute.xlu2 %1349 }
 0x3e4   : > { %v1352_v51 = vunpack.i.h.bf16 %v1350_v44  ;;  %v1351_v53 = vunpack.i.l.bf16 %v1350_v44  ;;  %v611_v44 = vadd.f32 %v610_v33, %v551_v30 }
 0x3e6   : > { %v880_v58 = vsel %vm483_vm4, %v1351_v53, %v1352_v51 }
 0x3eb   : > { %v865_v4 = vpop.permute.xlu2 %864 }
 0x3fb   : > { %v1345_v42 = vpop.permute.xlu1 %1344 }
 0x3fc   : > { %v1340_v43 = vpop.permute.xlu0 %1339  ;;  %v1347_v45 = vunpack.i.h.bf16 %v1345_v42  ;;  %v1346_v47 = vunpack.i.l.bf16 %v1345_v42 }
 0x3fd   : > { %v1342_v48 = vunpack.i.h.bf16 %v1340_v43  ;;  %v1341_v49 = vunpack.i.l.bf16 %v1340_v43  ;;  %v597_v43 = vadd.f32 %v596_v29, %v537_v28 }
 0x3fe   : > { %v870_v55 = vsel %vm470_vm3, %v1347_v45, %v1346_v47  ;;  %v868_v5 = vsel %vm470_vm3, %v865_v4, %v1347_v45  ;;  %v869_v8 = vsel %vm470_vm3, %v1346_v47, %v865_v4 }
 0x3ff   : > { %v856_v50 = vsel %vm457_vm2, %v1341_v49, %v1342_v48 }
 0x400   : > { %v861_v54 = vmax.f32 %v849_v35, %v856_v50  ;;  %v612_v35 = vpop.f32.mrf.mxu3 }
 0x402   : > { %v873_v56 = vmax.f32 %v861_v54, %v870_v55 }
 0x403   : > { %v1355_v57 = vpop.permute.xlu1 %1354 }
 0x404   : > { %v1357_v60 = vunpack.i.h.bf16 %v1355_v57  ;;  %v1356_v61 = vunpack.i.l.bf16 %v1355_v57  ;;  %v851_v46 = vpop.permute.xlu0 %850  ;;  %v885_v62 = vmax.f32 %v873_v56, %v880_v58 }
 0x405   : > { %v857_v52 = vsel %vm457_vm2, %v851_v46, %v1341_v49  ;;  %v858_v6 = vsel %vm457_vm2, %v1342_v48, %v851_v46  ;;  %v974_v48 = vpop.permute.xlu2 %973  ;;  %v599_v46 = vadd.f32 %v598_v32, %v539_v16 }
 0x406   : > { %v894_v63 = vsel %vm496_vm5, %v1357_v60, %v1356_v61  ;;  %v859_v1 = vmax.f32 %v847_v7, %v858_v6  ;;  %v860_v2 = vmax.f32 %v848_v34, %v857_v52  ;;  %v567_v7 = vpop.f32.mrf.mxu1  ;;  %v774_v34 = vpop.f32.mrf.mxu2  ;;  %v613_v52 = vadd.f32 %v612_v35, %v553_v59 }
 0x407   : > { %v897_v0 = vmax.f32 %v885_v62, %v894_v63 }
 0x408   : > { %v871_v13 = vmax.f32 %v859_v1, %v869_v8  ;;  %v872_v14 = vmax.f32 %v860_v2, %v868_v5  ;;  %v788_v39 = vpop.f32.mrf.mxu3 }
 0x409   : > { %v903_v3 = vpack.c.bf16 %v897_v0, %v897_v0  ;;  %v795_v45 = vadd.f32 %v788_v39, %v625_v40 }
 0x40b   : > { %v919_v9 = vsel %vm518_vm9, %v903_v3, 0  ;;  %v889_v11 = vpop.permute.xlu1 %888 }
 0x40c   : > { %v875_v12 = vpop.permute.xlu0 %874  ;;  %956 = vmatpush.bf16.msrb.mxu2 %v919_v9  ;;  %v892_v20 = vsel %vm496_vm5, %v889_v11, %v1357_v60  ;;  %v893_v21 = vsel %vm496_vm5, %v1356_v61, %v889_v11 }
 0x40d   : > { %v881_v15 = vsel %vm483_vm4, %v875_v12, %v1351_v53  ;;  %v882_v17 = vsel %vm483_vm4, %v1352_v51, %v875_v12  ;;  %v794_v51 = vadd.f32 %v774_v34, %v611_v44  ;;  %v627_v53 = vadd.f32 %v626_v41, %v567_v7 }
 0x40e   : > { %v883_v18 = vmax.f32 %v871_v13, %v882_v17  ;;  %v884_v19 = vmax.f32 %v872_v14, %v881_v15  ;;  %v760_v37 = vpop.f32.mrf.mxu1  ;;  %v776_v38 = vpop.f32.mrf.mxu2 }
 0x40f   : > { %1247 = vmatmul.msk.bf16.vlgmr.msrb.gmra.mxu2 %vm514_vm6, %v1263_v10  ;;  %v793_v50 = vadd.f32 %v760_v37, %v597_v43  ;;  %v797_v8 = vadd.f32 %v776_v38, %v613_v52 }
 0x410   : > { %v895_v22 = vmax.f32 %v883_v18, %v893_v21  ;;  %v896_v23 = vmax.f32 %v884_v19, %v892_v20  ;;  %v790_v57 = vpop.f32.mrf.mxu3 }
 0x411   : > { %v798_v63 = vadd.f32 %v790_v57, %v627_v53 }
 0x412   : > { %v901_v24 = vpack.c.bf16 %v895_v22, %v895_v22  ;;  %v902_v25 = vpack.c.bf16 %v896_v23, %v896_v23 }
 0x414   : > { %v913_v26 = vsel %vm518_vm9, %v901_v24, 0  ;;  %v916_v27 = vsel %vm518_vm9, %v902_v25, 0  ;;  %v979_v4 = vpop.permute.xlu0 %978 }
 0x415   : > { %928 = vmatpush.bf16.msrb.mxu0 %v913_v26  ;;  %942 = vmatpush.bf16.msrb.mxu1 %v916_v27 }
 0x416   : > { %v762_v42 = vpop.f32.mrf.mxu1 }
 0x417   : > { %v796_v5 = vadd.f32 %v762_v42, %v599_v46 }
 0x418   : > { %1245 = vmatmul.msk.bf16.vlgmr.msrb.gmra.mxu0 %vm514_vm6, %v1263_v10  ;;  %1246 = vmatmul.msk.bf16.vlgmr.msrb.gmra.mxu1 %vm514_vm6, %v1263_v10 }
 0x492   : > { %v958_v47 = vpop.f32.mrf.mxu2 }
 0x493   : > { %v965_v49 = vadd.f32 %v958_v47, %v795_v45 }
 0x495   : > { %v1856_v54 = vadd.f32 %v974_v48, %v965_v49  ;;  %v930_v55 = vpop.f32.mrf.mxu0  ;;  %v944_v56 = vpop.f32.mrf.mxu1 }
 0x496   : > { %v963_v58 = vadd.f32 %v930_v55, %v793_v50  ;;  %v964_v60 = vadd.f32 %v944_v56, %v794_v51 }
 0x497   : > { %v1250_v61 = vmul.f32 -1.442695, %v1856_v54 }
 0x498   : > { %v1859_v6 = vadd.f32 %v974_v48, %v963_v58  ;;  %v1861_v62 = vadd.f32 %v974_v48, %v964_v60 }
 0x499   : > { %1371 = vpow2.f32 %v1250_v61 }
 0x49a   : > { %v1248_v0 = vmul.f32 -1.442695, %v1859_v6  ;;  %v1249_v1 = vmul.f32 -1.442695, %v1861_v62  ;;  %v960_v2 = vpop.f32.mrf.mxu2 }
 0x49b   : > { %v968_v3 = vadd.f32 %v960_v2, %v798_v63 }
 0x49c   : > { %1373 = vpow2.f32 %v1248_v0 }
 0x49d   : > { %1375 = vpow2.f32 %v1249_v1  ;;  %v1865_v9 = vadd.f32 %v979_v4, %v968_v3  ;;  %v932_v10 = vpop.f32.mrf.mxu0  ;;  %v946_v11 = vpop.f32.mrf.mxu1 }
 0x49e   : > { %v966_v12 = vadd.f32 %v932_v10, %v796_v5  ;;  %v967_v13 = vadd.f32 %v946_v11, %v797_v8 }
 0x49f   : > { %v1372_v14 = vpop.eup %1371  ;;  %v1253_v15 = vmul.f32 -1.442695, %v1865_v9 }
 0x4a0   : > { %v1007_v17 = vadd.f32 1.0, %v1372_v14  ;;  %v1868_v18 = vadd.f32 %v979_v4, %v966_v12  ;;  %v1870_v19 = vadd.f32 %v979_v4, %v967_v13 }
 0x4a1   : > { %1377 = vpow2.f32 %v1253_v15 }
 0x4a2   : > { %v1374_v20 = vpop.eup %1373  ;;  %1379 = vrcp.f32 %v1007_v17  ;;  %v1251_v23 = vmul.f32 -1.442695, %v1868_v18  ;;  %v1252_v25 = vmul.f32 -1.442695, %v1870_v19  ;;  %v1050_v27 = vand.u32 2147483647, %v1007_v17 }
 0x4a3   : > { %v1376_v21 = vpop.eup %1375  ;;  %v1005_v22 = vadd.f32 1.0, %v1374_v20  ;;  %v1052_v29 = vand.u32 2147483648, %v1007_v17  ;;  %vm1046_vm7 = vweird.f32 %v1007_v17 }
 0x4a4   : > { %v1006_v24 = vadd.f32 1.0, %v1376_v21  ;;  %vm1878_vm8 = vcmp.eq.f32.partialorder %v1050_v27, 8.507059e+37 }
 0x4a5   : > { %1381 = vrcp.f32 %v1005_v22  ;;  %v1053_v7 = vor.u32 1.1754944e-38, %v1052_v29  ;;  %vm1016_vm9 = vweird.f32 %v1005_v22  ;;  %v1020_v35 = vand.u32 2147483647, %v1005_v22 }
 0x4a6   : > { %1383 = vrcp.f32 %v1006_v24  ;;  %v1022_v38 = vand.u32 2147483648, %v1005_v22  ;;  %vm1031_vm11 = vweird.f32 %v1006_v24  ;;  %v1035_v42 = vand.u32 2147483647, %v1006_v24 }
 0x4a7   : > { %v1378_v26 = vpop.eup %1377  ;;  %1385 = vpow2.f32 %v1251_v23  ;;  %v1037_v47 = vand.u32 2147483648, %v1006_v24  ;;  %vm1891_vm14 = vcmp.eq.f32.partialorder %v1020_v35, 8.507059e+37 }
 0x4a8   : > { %v1380_v28 = vpop.eup %1379  ;;  %v1874_v16 = vadd.f32 1.0, %v1378_v26  ;;  %1387 = vpow2.f32 %v1252_v25  ;;  %v1023_v60 = vor.u32 1.1754944e-38, %v1022_v38  ;;  %vm1899_vm0 = vcmp.eq.f32.partialorder %v1035_v42, 8.507059e+37 }
 0x4a9   : > { %v1042_v30 = vmul.f32 %v1380_v28, %v1007_v17  ;;  %vm1047_vm10 = vweird.f32 %v1380_v28  ;;  %v1038_v1 = vor.u32 1.1754944e-38, %v1037_v47 }
 0x4aa   : > { %1389 = vrcp.f32 %v1874_v16  ;;  %vm1048_vm12 = vmor %vm1046_vm7, %vm1047_vm10  ;;  %v1095_v2 = vand.u32 2147483647, %v1874_v16  ;;  %v1097_v3 = vand.u32 2147483648, %v1874_v16  ;;  %vm1091_vm4 = vweird.f32 %v1874_v16 }
 0x4ab   : > { %v1382_v31 = vpop.eup %1381  ;;  %v1043_v32 = vsub.f32 1.0, %v1042_v30 }
 0x4ac   : > { %v1384_v59 = vpop.eup %1383  ;;  %v1012_v34 = vmul.f32 %v1382_v31, %v1005_v22  ;;  %vm1017_vm13 = vweird.f32 %v1382_v31  ;;  %v1098_v15 = vor.u32 1.1754944e-38, %v1097_v3  ;;  %vm1096_vm6 = vcmp.eq.f32.partialorder %v1095_v2, 8.507059e+37 }
 0x4ad   : > { %v1386_v36 = vpop.eup %1385  ;;  %v1044_v37 = vmul.f32 %v1380_v28, %v1043_v32  ;;  %v1027_v39 = vmul.f32 %v1384_v59, %v1006_v24  ;;  %vm1032_vm15 = vweird.f32 %v1384_v59  ;;  %vm1018_vm1 = vmor %vm1016_vm9, %vm1017_vm13 }
 0x4ae   : > { %v1388_v40 = vpop.eup %1387  ;;  %v1013_v41 = vsub.f32 1.0, %v1012_v34  ;;  %v1886_v43 = vadd.f32 1.0, %v1386_v36  ;;  %vm1033_vm2 = vmor %vm1031_vm11, %vm1032_vm15 }
 0x4af   : > { %v1045_v44 = vadd.f32 %v1380_v28, %v1044_v37  ;;  %v1028_v45 = vsub.f32 1.0, %v1027_v39  ;;  %v1888_v48 = vadd.f32 1.0, %v1388_v40 }
 0x4b0   : > { %v1390_v49 = vpop.eup %1389  ;;  %v1014_v50 = vmul.f32 %v1382_v31, %v1013_v41  ;;  %1391 = vrcp.f32 %v1886_v43  ;;  %v1067_v22 = vand.u32 2147483648, %v1886_v43  ;;  %v1065_v25 = vand.u32 2147483647, %v1886_v43 }
 0x4b1   : > { %v1049_v53 = vsel %vm1048_vm12, %v1380_v28, %v1045_v44  ;;  %v1029_v55 = vmul.f32 %v1384_v59, %v1028_v45  ;;  %v1087_v56 = vmul.f32 %v1390_v49, %v1874_v16  ;;  %1393 = vrcp.f32 %v1888_v48 }
 0x4b2   : > { %v1054_v57 = vsel %vm1878_vm8, %v1053_v7, %v1049_v53  ;;  %v1015_v58 = vadd.f32 %v1382_v31, %v1014_v50  ;;  %vm1092_vm3 = vweird.f32 %v1390_v49  ;;  %vm1061_vm8 = vweird.f32 %v1886_v43 }
 0x4b3   : > { %v1103_v46 = vmul.f32 %v1054_v57, %v1856_v54  ;;  %v1030_v52 = vadd.f32 %v1384_v59, %v1029_v55  ;;  %v1088_v63 = vsub.f32 1.0, %v1087_v56  ;;  %vm1093_vm5 = vmor %vm1091_vm4, %vm1092_vm3  ;;  %v1082_v28 = vand.u32 2147483648, %v1888_v48 }
 0x4b4   : > { %v1019_v0 = vsel %vm1018_vm1, %v1382_v31, %v1015_v58  ;;  %v1068_v29 = vor.u32 1.1754944e-38, %v1067_v22  ;;  %v1080_v30 = vand.u32 2147483647, %v1888_v48  ;;  %vm1066_vm11 = vcmp.eq.f32.partialorder %v1065_v25, 8.507059e+37 }
 0x4b5   : > { %1109 = vst [vmem:[%s1910_s12 + $0x10] sm:$0xff] %v1103_v46  ;;  %v1024_v54 = vsel %vm1891_vm14, %v1023_v60, %v1019_v0  ;;  %v1034_v4 = vsel %vm1033_vm2, %v1384_v59, %v1030_v52  ;;  %v1089_v5 = vmul.f32 %v1390_v49, %v1088_v63  ;;  %vm1076_vm12 = vweird.f32 %v1888_v48 }
 0x4b6   : > { %v1392_v8 = vpop.eup %1391  ;;  %v1101_v10 = vmul.f32 %v1024_v54, %v1859_v6  ;;  %v1039_v11 = vsel %vm1899_vm0, %v1038_v1, %v1034_v4  ;;  %v1083_v59 = vor.u32 1.1754944e-38, %v1082_v28  ;;  %vm1081_vm14 = vcmp.eq.f32.partialorder %v1080_v30, 8.507059e+37 }
 0x4b7   : > { %v1102_v12 = vmul.f32 %v1039_v11, %v1861_v62  ;;  %v1090_v13 = vadd.f32 %v1390_v49, %v1089_v5  ;;  %v1057_v14 = vmul.f32 %v1392_v8, %v1886_v43  ;;  %v1394_v17 = vpop.eup %1393  ;;  %vm1062_vm7 = vweird.f32 %v1392_v8 }
 0x4b8   : > { %1107 = vst [vmem:[%s1910_s12] sm:$0xff] %v1101_v10  ;;  %v1072_v23 = vmul.f32 %v1394_v17, %v1888_v48  ;;  %vm1063_vm9 = vmor %vm1061_vm8, %vm1062_vm7  ;;  %vm1077_vm10 = vweird.f32 %v1394_v17 }
 0x4b9   : > { %1108 = vst [vmem:[%s1910_s12 + $0x8] sm:$0xff] %v1102_v12  ;;  %v1094_v20 = vsel %vm1093_vm5, %v1390_v49, %v1090_v13  ;;  %v1058_v6 = vsub.f32 1.0, %v1057_v14  ;;  %vm1078_vm13 = vmor %vm1076_vm12, %vm1077_vm10 }
 0x4ba   : > { %v1099_v21 = vsel %vm1096_vm6, %v1098_v15, %v1094_v20  ;;  %v1073_v26 = vsub.f32 1.0, %v1072_v23 }
 0x4bb   : > { %v1106_v62 = vmul.f32 %v1099_v21, %v1865_v9  ;;  %v1059_v24 = vmul.f32 %v1392_v8, %v1058_v6 }
 0x4bc   : > { %v1074_v16 = vmul.f32 %v1394_v17, %v1073_v26 }
 0x4bd   : > { %1112 = vst [vmem:[%s1910_s12 + $0x28] sm:$0xff] %v1106_v62  ;;  %v1060_v27 = vadd.f32 %v1392_v8, %v1059_v24 }
 0x4be   : > { %v1075_v32 = vadd.f32 %v1394_v17, %v1074_v16 }
 0x4bf   : > { %v1064_v9 = vsel %vm1063_vm9, %v1392_v8, %v1060_v27 }
 0x4c0   : > { %v1069_v31 = vsel %vm1066_vm11, %v1068_v29, %v1064_v9  ;;  %v1079_v7 = vsel %vm1078_vm13, %v1394_v17, %v1075_v32 }
 0x4c1   : > { %v1104_v33 = vmul.f32 %v1069_v31, %v1868_v18  ;;  %v1084_v34 = vsel %vm1081_vm14, %v1083_v59, %v1079_v7 }
 0x4c2   : > { %v1105_v35 = vmul.f32 %v1084_v34, %v1870_v19 }
 0x4c3   : > { %1110 = vst [vmem:[%s1910_s12 + $0x18] sm:$0xff] %v1104_v33 }
 0x4c4   : > { %1111 = vst [vmem:[%s1910_s12 + $0x20] sm:$0xff] %v1105_v35 }
 0x4c5   : > { %1422 = shalt.err (!%p1419_p3)
}
 0x4c6   : > { %s1468_s10 = smov 384   ;;  %s1469_s12 = smov 24  }
 0x4c7   : > { %1267 = dma.vmem_to_hbm [thread:$0]  (%p1543_p5), %s1127_s16, 768, %s1129_s17, %s1114_s18, %s1468_s10, %s1468_s10, %s1469_s12  }
 0x4c8 PF: > { %p1273_p4 = scmp.ge.s32.totalorder %s1457_s24, 2  ;;  %s1143_s13 = sand.u32 1, %s1445_s21  }
 0x4c9   : > { %s1144_s25 = scalar_lea.sflag [#allocation3], %s1143_s13 }
 0x4ca   : > { %p1270_p7 = pnand %p1273_p4, %p1547_p6 }
 0x4cc   : > { %p1271_p8 = pneg %p1270_p7 }
 0x4ce   : > { %1440 = dma.done.wait (%p1271_p8), %s1144_s25, 768  }
 0x4cf   : > { %1442 = vsyncadd (%p1271_p8), %s1144_s25, 4294966528  ;;  %p16_p9 = scmp.ge.s32.totalorder %s1530_s27, 4   ;;  %s1985_s21 = smov %s1449_s22 }
 0x4d0   : > { %s1986_s22 = smov %s1453_s23  ;;  %s1987_s23 = smov %s1541_s30 }
 0x4d1   : > { %s1988_s24 = smov %s1530_s27  ;;  %18 = sbr.rel (!%p16_p9) target bundleno = 3 (0x3), region = 82 }
 0x4d6   :  { %1150 = vsyncpa [#allocation3], 1 }
 0x4d7   :  { %1152 = vsyncpa [#allocation3 + $0x1], 1 }

</bundles_post_ra>
